<compile_context>
chip_gen: v7x
topology: tpu7x:2x2x1
jax: 0.10.0
libtpu: 0.0.40
codegen_flags: <defaults>
</compile_context>

<pallas_src>
import functools

import jax
import jax.numpy as jnp
from jax import lax
from jax.experimental import pallas as pl
from jax.experimental.pallas import tpu as pltpu


def _channel_attention_kernel(x_ref, w1t_ref, b1_ref, w2t_ref, b2_ref,
                              gate_ref, sum_sc, max_sc,
                              *, inv_hw, bt, thw, hw_true, need_mask):
    """Grid: (batch_tile, spatial_tile); spatial axis is a reduction.

    x_ref   : (Bt, C, thw)      streamed input tile (zero-padded tail possible)
    w1t_ref : (C, M)            first Linear weight, pre-transposed (resident)
    b1_ref  : (1, M)
    w2t_ref : (M, C)            second Linear weight, pre-transposed (resident)
    b2_ref  : (1, C)
    gate_ref: (Bt, 1, C)        per-channel sigmoid gate (written on last step)
    sum_sc  : (Bt, C, 128) f32  lane-wide running spatial sum (VMEM scratch)
    max_sc  : (Bt, C, 128) f32  lane-wide running spatial max (VMEM scratch)
    """
    s = pl.program_id(1)

    @pl.when(s == 0)
    def _init():
        sum_sc[...] = jnp.zeros(sum_sc.shape, jnp.float32)
        max_sc[...] = jnp.full(max_sc.shape, -jnp.inf, jnp.float32)

    nchunks = thw // 128
    lane = (lax.broadcasted_iota(jnp.int32, (1, 1, 128), 2)
            if need_mask else None)                       # hoisted out of loop

    def chunk_body(j, carry):
        acc_s, acc_m = carry
        off = pl.multiple_of(j * 128, 128)
        xc = x_ref[:, :, pl.ds(off, 128)].astype(jnp.float32)   # (Bt, C, 128)
        if need_mask:
            # Zero padding is neutral for the sum but not the max: mask the
            # out-of-range lanes (only ever the final chunk of the last step).
            xm = jnp.where(s * thw + off + lane < hw_true, xc, -jnp.inf)
        else:
            xm = xc
        # Pure VPU add/max per input vreg; no per-step cross-lane reduction.
        return acc_s + xc, jnp.maximum(acc_m, xm)

    acc_s, acc_m = lax.fori_loop(0, nchunks, chunk_body,
                                 (sum_sc[...], max_sc[...]),
                                 unroll=min(nchunks, 8))
    sum_sc[...] = acc_s
    max_sc[...] = acc_m

    @pl.when(s == pl.num_programs(1) - 1)
    def _finalize():
        avg = jnp.sum(sum_sc[...], axis=2) * inv_hw             # (Bt, C)
        mx = jnp.max(max_sc[...], axis=2)                       # (Bt, C)
        # Stack both pooled vectors -> one matmul per Linear instead of two.
        p = jnp.concatenate([avg, mx], axis=0)                  # (2*Bt, C)
        h = jnp.dot(p, w1t_ref[...],
                    preferred_element_type=jnp.float32) + b1_ref[...]
        h = jnp.maximum(h, 0.0)                                 # ReLU
        y = jnp.dot(h, w2t_ref[...],
                    preferred_element_type=jnp.float32) + b2_ref[...]
        gate = jax.nn.sigmoid(y[:bt] + y[bt:])                  # (Bt, C)
        gate_ref[...] = gate[:, None, :].astype(gate_ref.dtype)


def _tpu_config():
    """Returns (num_tensorcores, per-input-block byte cap, vmem_limit_bytes)."""
    cap = 128 << 20
    cores = 0
    try:
        info = pltpu.get_tpu_info()
        cap = int(getattr(info, "vmem_capacity_bytes",
                          getattr(info, "vmem_size_bytes", cap)))
        cores = int(getattr(info, "num_cores",
                            getattr(info, "tensorcore_count", 0)) or 0)
    except Exception:
        pass
    if cores <= 0:
        # TODO(synk): no portable TensorCore-count query; assume 2 TCs on
        # 64 MiB-VMEM (v7x-class) chips, 1 on v5e/v6e.
        cores = 2 if cap < (96 << 20) else 1
    if cap >= (96 << 20):                  # v5e / v6e class: 128 MiB VMEM
        return cores, 16 << 20, 64 << 20
    # v7x class: 64 MiB VMEM -> smaller streamed blocks, leave headroom.
    return cores, 10 << 20, min(48 << 20, (cap * 3) // 4)


def _pick_batch_tile(b, num_cores, max_bt=8):
    """Largest divisor of B (capped).  On multi-TensorCore chips prefer a tile
    whose grid-step count splits evenly across the cores (parallel axis); on
    single-TC chips just take the largest divisor (no forced extra steps)."""
    divisors = [d for d in range(1, min(b, max_bt) + 1) if b % d == 0]
    if num_cores > 1:
        for d in reversed(divisors):
            if (b // d) % num_cores == 0:
                return d
    return divisors[-1]


def _pick_spatial_tile(hw_pad, bt, c, itemsize, budget_bytes):
    """Largest multiple of 128 that divides hw_pad and keeps one (bt, C, tile)
    input block under budget_bytes (Pallas double-buffers the streamed input).
    Accounts for sublane padding when C < 8."""
    c_eff = -(-c // 8) * 8
    per_lane = max(1, bt * c_eff * itemsize)
    cap = max(128, budget_bytes // per_lane)
    best, t = 128, 128
    while t <= hw_pad:
        if hw_pad % t == 0 and t <= cap:
            best = t
        t += 128
    return best


def channel_attention(x, w1, b1, w2, b2, *, spatial_tile=None):
    """x: (B, C, H, W).  w1: (M, C), b1: (M,), w2: (C, M), b2: (C,).
    Returns the CBAM channel gate broadcast to (B, C, H, W) (matches module)."""
    B, C, H, W = x.shape
    M = w1.shape[0]
    HW = H * W
    HW_pad = -(-HW // 128) * 128                 # lane-align; zero-pad the tail

    num_cores, block_cap, vmem_limit = _tpu_config()
    bt = _pick_batch_tile(B, num_cores)

    c_eff = -(-C // 8) * 8
    weights_bytes = 2 * 4 * (2 * C * M + M + C)            # pessimistic 2 bufs
    scratch_bytes = 2 * bt * c_eff * 128 * 4
    budget = min(block_cap,
                 max(1 << 20,
                     (vmem_limit - weights_bytes - scratch_bytes - (4 << 20)) // 2))

    if spatial_tile is None:
        thw = _pick_spatial_tile(HW_pad, bt, C, x.dtype.itemsize, budget)
    else:
        thw = int(spatial_tile)
        assert thw % 128 == 0 and HW_pad % thw == 0, (
            "spatial_tile must be a multiple of 128 that divides the padded HW")
    assert B % bt == 0 and HW_pad % thw == 0

    x_flat = x.reshape(B, C, HW)
    if HW_pad != HW:
        x_flat = jnp.pad(x_flat, ((0, 0), (0, 0), (0, HW_pad - HW)))

    w1t = w1.T                                   # (C, M)
    w2t = w2.T                                   # (M, C)
    b1_2d = b1.reshape(1, M)
    b2_2d = b2.reshape(1, C)

    kernel = functools.partial(
        _channel_attention_kernel,
        inv_hw=1.0 / float(HW), bt=bt, thw=thw, hw_true=HW,
        need_mask=(HW_pad != HW))

    def make_call(single_buffer_weights):
        def resident(shape):
            # Constant-index operands: single-buffer them to reclaim VMEM for
            # the streamed input (matters most under v7x's 64 MiB VMEM).
            if single_buffer_weights:
                return pl.BlockSpec(shape, lambda b, s: (0, 0),
                                    pipeline_mode=pl.Buffered(1))
            return pl.BlockSpec(shape, lambda b, s: (0, 0))

        return pl.pallas_call(
            kernel,
            out_shape=jax.ShapeDtypeStruct((B, 1, C), x.dtype),
            grid_spec=pltpu.PrefetchScalarGridSpec(
                num_scalar_prefetch=0,
                grid=(B // bt, HW_pad // thw),
                in_specs=[
                    pl.BlockSpec((bt, C, thw), lambda b, s: (b, 0, s)),
                    resident((C, M)),            # w1^T (resident)
                    resident((1, M)),            # b1
                    resident((M, C)),            # w2^T (resident)
                    resident((1, C)),            # b2
                ],
                out_specs=pl.BlockSpec((bt, 1, C), lambda b, s: (b, 0, 0)),
                scratch_shapes=[
                    pltpu.VMEM((bt, C, 128), jnp.float32),   # lane-wide sum
                    pltpu.VMEM((bt, C, 128), jnp.float32),   # lane-wide max
                ],
            ),
            compiler_params=pltpu.CompilerParams(
                dimension_semantics=("parallel", "arbitrary"),
                vmem_limit_bytes=vmem_limit,
            ),
        )

    args = (x_flat, w1t, b1_2d, w2t, b2_2d)
    try:
        gate = make_call(True)(*args)
    except Exception:
        # pipeline_mode=pl.Buffered(1) not supported by this jax version:
        # fall back to default double-buffered resident weights (same math).
        gate = make_call(False)(*args)

    gate = gate.reshape(B, C)
    # Spatial broadcast (== sig_pool.unsqueeze(2).unsqueeze(3).repeat(...)) is
    # left to XLA so it can fuse into downstream consumers.
    return jnp.broadcast_to(gate[:, :, None, None], (B, C, H, W))


def reference(x, w1, b1, w2, b2):
    """Pure-JAX reference mirroring the PyTorch forward."""
    B, C, H, W = x.shape
    avg = jnp.mean(x, axis=(2, 3))               # (B, C)
    mx = jnp.max(x, axis=(2, 3))                 # (B, C)

    def bck(p):
        h = jnp.maximum(p @ w1.T + b1, 0.0)
        return h @ w2.T + b2

    sig = jax.nn.sigmoid(bck(avg) + bck(mx))     # (B, C)
    return jnp.broadcast_to(sig[:, :, None, None], (B, C, H, W))


if __name__ == "__main__":
    # Module config: n_channels_in=4, reduction_ratio=2 -> middle_layer_size=2
    B, C, H, W = 2, 4, 16, 16
    reduction_ratio = 2
    M = int(C / float(reduction_ratio))

    key = jax.random.PRNGKey(0)
    kx, k1, k2, k3, k4, kx2 = jax.random.split(key, 6)

    x = jax.random.normal(kx, (B, C, H, W), dtype=jnp.float32)
    # nn.Linear(C, M): weight (M, C), bias (M,); nn.Linear(M, C): weight (C, M), bias (C,)
    w1 = jax.random.normal(k1, (M, C), dtype=jnp.float32) * 0.5
    b1 = jax.random.normal(k2, (M,), dtype=jnp.float32) * 0.1
    w2 = jax.random.normal(k3, (C, M), dtype=jnp.float32) * 0.5
    b2 = jax.random.normal(k4, (C,), dtype=jnp.float32) * 0.1

    ref = reference(x, w1, b1, w2, b2)

    # Default tiling (single spatial step at this small shape).
    out = jax.block_until_ready(channel_attention(x, w1, b1, w2, b2))
    assert out.shape == (B, C, H, W)
    assert jnp.allclose(out, ref, atol=1e-5, rtol=1e-5), "mismatch vs reference"

    # Force the multi-step streamed accumulation path (2 spatial tiles of 128).
    out_tiled = jax.block_until_ready(
        channel_attention(x, w1, b1, w2, b2, spatial_tile=128))
    assert jnp.allclose(out_tiled, ref, atol=1e-5, rtol=1e-5), \
        "mismatch vs reference (tiled spatial reduction)"

    # Non-128-aligned spatial extent exercises the zero-pad + masked-max path.
    H2 = W2 = 5
    x2 = jax.random.normal(kx2, (B, C, H2, W2), dtype=jnp.float32)
    ref2 = reference(x2, w1, b1, w2, b2)
    out2 = jax.block_until_ready(channel_attention(x2, w1, b1, w2, b2))
    assert out2.shape == (B, C, H2, W2)
    assert jnp.allclose(out2, ref2, atol=1e-5, rtol=1e-5), \
        "mismatch vs reference (padded / masked spatial tail)"

    print("KERNEL_OK")
</pallas_src>

<mosaic_0001>
module attributes {stable_mosaic.version = 11 : i64} {
  func.func @_channel_attention_kernel(%arg0: i32, %arg1: i32, %arg2: memref<2x4x256xf32, #tpu.memory_space<vmem>>, %arg3: memref<4x2xf32, #tpu.memory_space<vmem>>, %arg4: memref<1x2xf32, #tpu.memory_space<vmem>>, %arg5: memref<2x4xf32, #tpu.memory_space<vmem>>, %arg6: memref<1x4xf32, #tpu.memory_space<vmem>>, %arg7: memref<2x1x4xf32, #tpu.memory_space<vmem>>, %arg8: memref<2x4x128xf32, #tpu.memory_space<vmem>>, %arg9: memref<2x4x128xf32, #tpu.memory_space<vmem>>) attributes {dimension_semantics = [#tpu.dimension_semantics<parallel>, #tpu.dimension_semantics<arbitrary>], iteration_bounds = array<i64: 1, 1>, scalar_prefetch = 0 : i64, scratch_operands = 2 : i64, tpu.core_type = #tpu.core_type<tc>, window_params = [{transform_indices = @transform_0, window_bounds = array<i64: 2, 4, 256>}, {pipeline_mode = #tpu.pipeline_mode<synchronous>, transform_indices = @transform_1, window_bounds = array<i64: 4, 2>}, {pipeline_mode = #tpu.pipeline_mode<synchronous>, transform_indices = @transform_2, window_bounds = array<i64: 1, 2>}, {pipeline_mode = #tpu.pipeline_mode<synchronous>, transform_indices = @transform_3, window_bounds = array<i64: 2, 4>}, {pipeline_mode = #tpu.pipeline_mode<synchronous>, transform_indices = @transform_4, window_bounds = array<i64: 1, 4>}, {transform_indices = @transform_5, window_bounds = array<i64: 2, 1, 4>}]} {
    %c0_i32 = arith.constant 0 : i32
    %0 = arith.cmpi eq, %arg1, %c0_i32 : i32
    %1 = arith.extui %0 : i1 to i32
    %c0_i32_0 = arith.constant 0 : i32
    %2 = arith.cmpi ne, %1, %c0_i32_0 : i32
    scf.if %2 {
      %cst = arith.constant 0.000000e+00 : f32
      %22 = vector.broadcast %cst : f32 to vector<2x4x128xf32>
      %c0_20 = arith.constant 0 : index
      %c0_21 = arith.constant 0 : index
      %c0_22 = arith.constant 0 : index
      %23 = vector.load %arg8[%c0_20, %c0_21, %c0_22] : memref<2x4x128xf32, #tpu.memory_space<vmem>>, vector<2x4x128xf32>
      tpu.vector_store %arg8[%c0_20, %c0_21, %c0_22], %22 {strides = array<i32>} : memref<2x4x128xf32, #tpu.memory_space<vmem>>, vector<2x4x128xf32>,
      %cst_23 = arith.constant 0xFF800000 : f32
      %24 = vector.broadcast %cst_23 : f32 to vector<2x4x128xf32>
      %c0_24 = arith.constant 0 : index
      %c0_25 = arith.constant 0 : index
      %c0_26 = arith.constant 0 : index
      %25 = vector.load %arg9[%c0_24, %c0_25, %c0_26] : memref<2x4x128xf32, #tpu.memory_space<vmem>>, vector<2x4x128xf32>
      tpu.vector_store %arg9[%c0_24, %c0_25, %c0_26], %24 {strides = array<i32>} : memref<2x4x128xf32, #tpu.memory_space<vmem>>, vector<2x4x128xf32>,
    } else {
    }
    %c0 = arith.constant 0 : index
    %c0_1 = arith.constant 0 : index
    %c0_2 = arith.constant 0 : index
    %3 = vector.load %arg8[%c0, %c0_1, %c0_2] : memref<2x4x128xf32, #tpu.memory_space<vmem>>, vector<2x4x128xf32>
    %c0_3 = arith.constant 0 : index
    %c0_4 = arith.constant 0 : index
    %c0_5 = arith.constant 0 : index
    %4 = vector.load %arg9[%c0_3, %c0_4, %c0_5] : memref<2x4x128xf32, #tpu.memory_space<vmem>>, vector<2x4x128xf32>
    %c0_i32_6 = arith.constant 0 : i32
    %c128_i32 = arith.constant 128 : i32
    %5 = arith.muli %c0_i32_6, %c128_i32 : i32
    %6 = tpu.assume_multiple %5, 128 : i32
    %c0_7 = arith.constant 0 : index
    %c0_8 = arith.constant 0 : index
    %7 = arith.index_cast %6 : i32 to index
    %8 = vector.load %arg2[%c0_7, %c0_8, %7] : memref<2x4x256xf32, #tpu.memory_space<vmem>>, vector<2x4x128xf32>
    %9 = arith.addf %3, %8 : vector<2x4x128xf32>
    %10 = arith.maximumf %4, %8 : vector<2x4x128xf32>
    %c1_i32 = arith.constant 1 : i32
    %c128_i32_9 = arith.constant 128 : i32
    %11 = arith.muli %c1_i32, %c128_i32_9 : i32
    %12 = tpu.assume_multiple %11, 128 : i32
    %c0_10 = arith.constant 0 : index
    %c0_11 = arith.constant 0 : index
    %13 = arith.index_cast %12 : i32 to index
    %14 = vector.load %arg2[%c0_10, %c0_11, %13] : memref<2x4x256xf32, #tpu.memory_space<vmem>>, vector<2x4x128xf32>
    %15 = arith.addf %9, %14 : vector<2x4x128xf32>
    %16 = arith.maximumf %10, %14 : vector<2x4x128xf32>
    %c2_i32 = arith.constant 2 : i32
    %c0_12 = arith.constant 0 : index
    %c0_13 = arith.constant 0 : index
    %c0_14 = arith.constant 0 : index
    %17 = vector.load %arg8[%c0_12, %c0_13, %c0_14] : memref<2x4x128xf32, #tpu.memory_space<vmem>>, vector<2x4x128xf32>
    tpu.vector_store %arg8[%c0_12, %c0_13, %c0_14], %15 {strides = array<i32>} : memref<2x4x128xf32, #tpu.memory_space<vmem>>, vector<2x4x128xf32>,
    %c0_15 = arith.constant 0 : index
    %c0_16 = arith.constant 0 : index
    %c0_17 = arith.constant 0 : index
    %18 = vector.load %arg9[%c0_15, %c0_16, %c0_17] : memref<2x4x128xf32, #tpu.memory_space<vmem>>, vector<2x4x128xf32>
    tpu.vector_store %arg9[%c0_15, %c0_16, %c0_17], %16 {strides = array<i32>} : memref<2x4x128xf32, #tpu.memory_space<vmem>>, vector<2x4x128xf32>,
    %c0_i32_18 = arith.constant 0 : i32
    %19 = arith.cmpi eq, %arg1, %c0_i32_18 : i32
    %20 = arith.extui %19 : i1 to i32
    %c0_i32_19 = arith.constant 0 : i32
    %21 = arith.cmpi ne, %20, %c0_i32_19 : i32
    scf.if %21 {
      %c0_20 = arith.constant 0 : index
      %c0_21 = arith.constant 0 : index
      %c0_22 = arith.constant 0 : index
      %22 = vector.load %arg8[%c0_20, %c0_21, %c0_22] : memref<2x4x128xf32, #tpu.memory_space<vmem>>, vector<2x4x128xf32>
      %cst = arith.constant dense<0.000000e+00> : vector<2x4xf32>
      %23 = vector.multi_reduction <add>, %22, %cst [2] : vector<2x4x128xf32> to vector<2x4xf32>
      %cst_23 = arith.constant 3.906250e-03 : f32
      %24 = vector.broadcast %cst_23 : f32 to vector<2x4xf32>
      %25 = arith.mulf %23, %24 : vector<2x4xf32>
      %c0_24 = arith.constant 0 : index
      %c0_25 = arith.constant 0 : index
      %c0_26 = arith.constant 0 : index
      %26 = vector.load %arg9[%c0_24, %c0_25, %c0_26] : memref<2x4x128xf32, #tpu.memory_space<vmem>>, vector<2x4x128xf32>
      %cst_27 = arith.constant dense<0xFF800000> : vector<2x4xf32>
      %27 = vector.multi_reduction <maximumf>, %26, %cst_27 [2] : vector<2x4x128xf32> to vector<2x4xf32>
      %28 = tpu.concatenate %25, %27 in 0 : vector<2x4xf32>, vector<2x4xf32> -> vector<4x4xf32>
      %c0_28 = arith.constant 0 : index
      %c0_29 = arith.constant 0 : index
      %29 = vector.load %arg3[%c0_28, %c0_29] : memref<4x2xf32, #tpu.memory_space<vmem>>, vector<4x2xf32>
      %cst_30 = arith.constant dense<0.000000e+00> : vector<4x2xf32>
      %30 = tpu.matmul %28, %29, %cst_30 {dimension_numbers = #tpu.dot_dimension_numbers<[1], [0], [0], [1], [0, 0, 1, 1], [], []>} : vector<4x4xf32>, vector<4x2xf32>, vector<4x2xf32> -> vector<4x2xf32>
      %c0_31 = arith.constant 0 : index
      %c0_32 = arith.constant 0 : index
      %31 = vector.load %arg4[%c0_31, %c0_32] : memref<1x2xf32, #tpu.memory_space<vmem>>, vector<1x2xf32>
      %32 = vector.broadcast %31 : vector<1x2xf32> to vector<4x2xf32>
      %33 = arith.addf %30, %32 : vector<4x2xf32>
      %cst_33 = arith.constant 0.000000e+00 : f32
      %34 = vector.broadcast %cst_33 : f32 to vector<4x2xf32>
      %35 = arith.maximumf %33, %34 : vector<4x2xf32>
      %c0_34 = arith.constant 0 : index
      %c0_35 = arith.constant 0 : index
      %36 = vector.load %arg5[%c0_34, %c0_35] : memref<2x4xf32, #tpu.memory_space<vmem>>, vector<2x4xf32>
      %cst_36 = arith.constant dense<0.000000e+00> : vector<4x4xf32>
      %37 = tpu.matmul %35, %36, %cst_36 {dimension_numbers = #tpu.dot_dimension_numbers<[1], [0], [0], [1], [0, 0, 1, 1], [], []>} : vector<4x2xf32>, vector<2x4xf32>, vector<4x4xf32> -> vector<4x4xf32>
      %c0_37 = arith.constant 0 : index
      %c0_38 = arith.constant 0 : index
      %38 = vector.load %arg6[%c0_37, %c0_38] : memref<1x4xf32, #tpu.memory_space<vmem>>, vector<1x4xf32>
      %39 = vector.broadcast %38 : vector<1x4xf32> to vector<4x4xf32>
      %40 = arith.addf %37, %39 : vector<4x4xf32>
      %41 = vector.extract_strided_slice %40 {offsets = [0, 0], sizes = [2, 4], strides = [1, 1]} : vector<4x4xf32> to vector<2x4xf32>
      %42 = vector.extract_strided_slice %40 {offsets = [2, 0], sizes = [2, 4], strides = [1, 1]} : vector<4x4xf32> to vector<2x4xf32>
      %43 = arith.addf %41, %42 : vector<2x4xf32>
      %44 = arith.negf %43 : vector<2x4xf32>
      %45 = math.exp %44 : vector<2x4xf32>
      %cst_39 = arith.constant 1.000000e+00 : f32
      %46 = vector.broadcast %cst_39 : f32 to vector<2x4xf32>
      %47 = arith.addf %46, %45 : vector<2x4xf32>
      %48 = arith.divf %46, %47 : vector<2x4xf32>
      %49 = vector.shape_cast %48 : vector<2x4xf32> to vector<2x1x4xf32>
      %c0_40 = arith.constant 0 : index
      %c0_41 = arith.constant 0 : index
      %c0_42 = arith.constant 0 : index
      %50 = vector.load %arg7[%c0_40, %c0_41, %c0_42] : memref<2x1x4xf32, #tpu.memory_space<vmem>>, vector<2x1x4xf32>
      tpu.vector_store %arg7[%c0_40, %c0_41, %c0_42], %49 {strides = array<i32>} : memref<2x1x4xf32, #tpu.memory_space<vmem>>, vector<2x1x4xf32>,
    } else {
    }
    return
  }
  func.func @transform_0(%arg0: i32, %arg1: i32) -> (i32, i32, i32) {
    %c0_i32 = arith.constant 0 : i32
    %c0_i32_0 = arith.constant 0 : i32
    return %arg0, %c0_i32, %arg1 : i32, i32, i32
  }
  func.func @transform_1(%arg0: i32, %arg1: i32) -> (i32, i32) {
    %c0_i32 = arith.constant 0 : i32
    %c0_i32_0 = arith.constant 0 : i32
    %c0_i32_1 = arith.constant 0 : i32
    return %c0_i32, %c0_i32_0 : i32, i32
  }
  func.func @transform_2(%arg0: i32, %arg1: i32) -> (i32, i32) {
    %c0_i32 = arith.constant 0 : i32
    %c0_i32_0 = arith.constant 0 : i32
    %c0_i32_1 = arith.constant 0 : i32
    return %c0_i32, %c0_i32_0 : i32, i32
  }
  func.func @transform_3(%arg0: i32, %arg1: i32) -> (i32, i32) {
    %c0_i32 = arith.constant 0 : i32
    %c0_i32_0 = arith.constant 0 : i32
    %c0_i32_1 = arith.constant 0 : i32
    return %c0_i32, %c0_i32_0 : i32, i32
  }
  func.func @transform_4(%arg0: i32, %arg1: i32) -> (i32, i32) {
    %c0_i32 = arith.constant 0 : i32
    %c0_i32_0 = arith.constant 0 : i32
    %c0_i32_1 = arith.constant 0 : i32
    return %c0_i32, %c0_i32_0 : i32, i32
  }
  func.func @transform_5(%arg0: i32, %arg1: i32) -> (i32, i32, i32) {
    %c0_i32 = arith.constant 0 : i32
    %c0_i32_0 = arith.constant 0 : i32
    %c0_i32_1 = arith.constant 0 : i32
    return %arg0, %c0_i32, %c0_i32_0 : i32, i32, i32
  }
}

module attributes {stable_mosaic.version = 11 : i64} {
  func.func @_channel_attention_kernel(%arg0: i32, %arg1: i32, %arg2: memref<2x4x256xf32, #tpu.memory_space<vmem>>, %arg3: memref<4x2xf32, #tpu.memory_space<vmem>>, %arg4: memref<1x2xf32, #tpu.memory_space<vmem>>, %arg5: memref<2x4xf32, #tpu.memory_space<vmem>>, %arg6: memref<1x4xf32, #tpu.memory_space<vmem>>, %arg7: memref<2x1x4xf32, #tpu.memory_space<vmem>>, %arg8: memref<2x4x128xf32, #tpu.memory_space<vmem>>, %arg9: memref<2x4x128xf32, #tpu.memory_space<vmem>>) attributes {dimension_semantics = [#tpu.dimension_semantics<parallel>, #tpu.dimension_semantics<arbitrary>], iteration_bounds = array<i64: 1, 1>, scalar_prefetch = 0 : i64, scratch_operands = 2 : i64, tpu.core_type = #tpu.core_type<tc>, window_params = [{transform_indices = @transform_0, window_bounds = array<i64: 2, 4, 256>}, {pipeline_mode = #tpu.pipeline_mode<synchronous>, transform_indices = @transform_1, window_bounds = array<i64: 4, 2>}, {pipeline_mode = #tpu.pipeline_mode<synchronous>, transform_indices = @transform_2, window_bounds = array<i64: 1, 2>}, {pipeline_mode = #tpu.pipeline_mode<synchronous>, transform_indices = @transform_3, window_bounds = array<i64: 2, 4>}, {pipeline_mode = #tpu.pipeline_mode<synchronous>, transform_indices = @transform_4, window_bounds = array<i64: 1, 4>}, {transform_indices = @transform_5, window_bounds = array<i64: 2, 1, 4>}]} {
    %c0_i32 = arith.constant 0 : i32
    %0 = arith.cmpi eq, %arg1, %c0_i32 : i32
    %1 = arith.extui %0 : i1 to i32
    %c0_i32_0 = arith.constant 0 : i32
    %2 = arith.cmpi ne, %1, %c0_i32_0 : i32
    scf.if %2 {
      %cst = arith.constant 0.000000e+00 : f32
      %22 = vector.broadcast %cst : f32 to vector<2x4x128xf32>
      %c0_20 = arith.constant 0 : index
      %c0_21 = arith.constant 0 : index
      %c0_22 = arith.constant 0 : index
      %23 = vector.load %arg8[%c0_20, %c0_21, %c0_22] : memref<2x4x128xf32, #tpu.memory_space<vmem>>, vector<2x4x128xf32>
      tpu.vector_store %arg8[%c0_20, %c0_21, %c0_22], %22 {strides = array<i32>} : memref<2x4x128xf32, #tpu.memory_space<vmem>>, vector<2x4x128xf32>,
      %cst_23 = arith.constant 0xFF800000 : f32
      %24 = vector.broadcast %cst_23 : f32 to vector<2x4x128xf32>
      %c0_24 = arith.constant 0 : index
      %c0_25 = arith.constant 0 : index
      %c0_26 = arith.constant 0 : index
      %25 = vector.load %arg9[%c0_24, %c0_25, %c0_26] : memref<2x4x128xf32, #tpu.memory_space<vmem>>, vector<2x4x128xf32>
      tpu.vector_store %arg9[%c0_24, %c0_25, %c0_26], %24 {strides = array<i32>} : memref<2x4x128xf32, #tpu.memory_space<vmem>>, vector<2x4x128xf32>,
    } else {
    }
    %c0 = arith.constant 0 : index
    %c0_1 = arith.constant 0 : index
    %c0_2 = arith.constant 0 : index
    %3 = vector.load %arg8[%c0, %c0_1, %c0_2] : memref<2x4x128xf32, #tpu.memory_space<vmem>>, vector<2x4x128xf32>
    %c0_3 = arith.constant 0 : index
    %c0_4 = arith.constant 0 : index
    %c0_5 = arith.constant 0 : index
    %4 = vector.load %arg9[%c0_3, %c0_4, %c0_5] : memref<2x4x128xf32, #tpu.memory_space<vmem>>, vector<2x4x128xf32>
    %c0_i32_6 = arith.constant 0 : i32
    %c128_i32 = arith.constant 128 : i32
    %5 = arith.muli %c0_i32_6, %c128_i32 : i32
    %6 = tpu.assume_multiple %5, 128 : i32
    %c0_7 = arith.constant 0 : index
    %c0_8 = arith.constant 0 : index
    %7 = arith.index_cast %6 : i32 to index
    %8 = vector.load %arg2[%c0_7, %c0_8, %7] : memref<2x4x256xf32, #tpu.memory_space<vmem>>, vector<2x4x128xf32>
    %9 = arith.addf %3, %8 : vector<2x4x128xf32>
    %10 = arith.maximumf %4, %8 : vector<2x4x128xf32>
    %c1_i32 = arith.constant 1 : i32
    %c128_i32_9 = arith.constant 128 : i32
    %11 = arith.muli %c1_i32, %c128_i32_9 : i32
    %12 = tpu.assume_multiple %11, 128 : i32
    %c0_10 = arith.constant 0 : index
    %c0_11 = arith.constant 0 : index
    %13 = arith.index_cast %12 : i32 to index
    %14 = vector.load %arg2[%c0_10, %c0_11, %13] : memref<2x4x256xf32, #tpu.memory_space<vmem>>, vector<2x4x128xf32>
    %15 = arith.addf %9, %14 : vector<2x4x128xf32>
    %16 = arith.maximumf %10, %14 : vector<2x4x128xf32>
    %c2_i32 = arith.constant 2 : i32
    %c0_12 = arith.constant 0 : index
    %c0_13 = arith.constant 0 : index
    %c0_14 = arith.constant 0 : index
    %17 = vector.load %arg8[%c0_12, %c0_13, %c0_14] : memref<2x4x128xf32, #tpu.memory_space<vmem>>, vector<2x4x128xf32>
    tpu.vector_store %arg8[%c0_12, %c0_13, %c0_14], %15 {strides = array<i32>} : memref<2x4x128xf32, #tpu.memory_space<vmem>>, vector<2x4x128xf32>,
    %c0_15 = arith.constant 0 : index
    %c0_16 = arith.constant 0 : index
    %c0_17 = arith.constant 0 : index
    %18 = vector.load %arg9[%c0_15, %c0_16, %c0_17] : memref<2x4x128xf32, #tpu.memory_space<vmem>>, vector<2x4x128xf32>
    tpu.vector_store %arg9[%c0_15, %c0_16, %c0_17], %16 {strides = array<i32>} : memref<2x4x128xf32, #tpu.memory_space<vmem>>, vector<2x4x128xf32>,
    %c0_i32_18 = arith.constant 0 : i32
    %19 = arith.cmpi eq, %arg1, %c0_i32_18 : i32
    %20 = arith.extui %19 : i1 to i32
    %c0_i32_19 = arith.constant 0 : i32
    %21 = arith.cmpi ne, %20, %c0_i32_19 : i32
    scf.if %21 {
      %c0_20 = arith.constant 0 : index
      %c0_21 = arith.constant 0 : index
      %c0_22 = arith.constant 0 : index
      %22 = vector.load %arg8[%c0_20, %c0_21, %c0_22] : memref<2x4x128xf32, #tpu.memory_space<vmem>>, vector<2x4x128xf32>
      %cst = arith.constant dense<0.000000e+00> : vector<2x4xf32>
      %23 = vector.multi_reduction <add>, %22, %cst [2] : vector<2x4x128xf32> to vector<2x4xf32>
      %cst_23 = arith.constant 3.906250e-03 : f32
      %24 = vector.broadcast %cst_23 : f32 to vector<2x4xf32>
      %25 = arith.mulf %23, %24 : vector<2x4xf32>
      %c0_24 = arith.constant 0 : index
      %c0_25 = arith.constant 0 : index
      %c0_26 = arith.constant 0 : index
      %26 = vector.load %arg9[%c0_24, %c0_25, %c0_26] : memref<2x4x128xf32, #tpu.memory_space<vmem>>, vector<2x4x128xf32>
      %cst_27 = arith.constant dense<0xFF800000> : vector<2x4xf32>
      %27 = vector.multi_reduction <maximumf>, %26, %cst_27 [2] : vector<2x4x128xf32> to vector<2x4xf32>
      %28 = tpu.concatenate %25, %27 in 0 : vector<2x4xf32>, vector<2x4xf32> -> vector<4x4xf32>
      %c0_28 = arith.constant 0 : index
      %c0_29 = arith.constant 0 : index
      %29 = vector.load %arg3[%c0_28, %c0_29] : memref<4x2xf32, #tpu.memory_space<vmem>>, vector<4x2xf32>
      %cst_30 = arith.constant dense<0.000000e+00> : vector<4x2xf32>
      %30 = tpu.matmul %28, %29, %cst_30 {dimension_numbers = #tpu.dot_dimension_numbers<[1], [0], [0], [1], [0, 0, 1, 1], [], []>} : vector<4x4xf32>, vector<4x2xf32>, vector<4x2xf32> -> vector<4x2xf32>
      %c0_31 = arith.constant 0 : index
      %c0_32 = arith.constant 0 : index
      %31 = vector.load %arg4[%c0_31, %c0_32] : memref<1x2xf32, #tpu.memory_space<vmem>>, vector<1x2xf32>
      %32 = vector.broadcast %31 : vector<1x2xf32> to vector<4x2xf32>
      %33 = arith.addf %30, %32 : vector<4x2xf32>
      %cst_33 = arith.constant 0.000000e+00 : f32
      %34 = vector.broadcast %cst_33 : f32 to vector<4x2xf32>
      %35 = arith.maximumf %33, %34 : vector<4x2xf32>
      %c0_34 = arith.constant 0 : index
      %c0_35 = arith.constant 0 : index
      %36 = vector.load %arg5[%c0_34, %c0_35] : memref<2x4xf32, #tpu.memory_space<vmem>>, vector<2x4xf32>
      %cst_36 = arith.constant dense<0.000000e+00> : vector<4x4xf32>
      %37 = tpu.matmul %35, %36, %cst_36 {dimension_numbers = #tpu.dot_dimension_numbers<[1], [0], [0], [1], [0, 0, 1, 1], [], []>} : vector<4x2xf32>, vector<2x4xf32>, vector<4x4xf32> -> vector<4x4xf32>
      %c0_37 = arith.constant 0 : index
      %c0_38 = arith.constant 0 : index
      %38 = vector.load %arg6[%c0_37, %c0_38] : memref<1x4xf32, #tpu.memory_space<vmem>>, vector<1x4xf32>
      %39 = vector.broadcast %38 : vector<1x4xf32> to vector<4x4xf32>
      %40 = arith.addf %37, %39 : vector<4x4xf32>
      %41 = vector.extract_strided_slice %40 {offsets = [0, 0], sizes = [2, 4], strides = [1, 1]} : vector<4x4xf32> to vector<2x4xf32>
      %42 = vector.extract_strided_slice %40 {offsets = [2, 0], sizes = [2, 4], strides = [1, 1]} : vector<4x4xf32> to vector<2x4xf32>
      %43 = arith.addf %41, %42 : vector<2x4xf32>
      %44 = arith.negf %43 : vector<2x4xf32>
      %45 = math.exp %44 : vector<2x4xf32>
      %cst_39 = arith.constant 1.000000e+00 : f32
      %46 = vector.broadcast %cst_39 : f32 to vector<2x4xf32>
      %47 = arith.addf %46, %45 : vector<2x4xf32>
      %48 = arith.divf %46, %47 : vector<2x4xf32>
      %49 = vector.shape_cast %48 : vector<2x4xf32> to vector<2x1x4xf32>
      %c0_40 = arith.constant 0 : index
      %c0_41 = arith.constant 0 : index
      %c0_42 = arith.constant 0 : index
      %50 = vector.load %arg7[%c0_40, %c0_41, %c0_42] : memref<2x1x4xf32, #tpu.memory_space<vmem>>, vector<2x1x4xf32>
      tpu.vector_store %arg7[%c0_40, %c0_41, %c0_42], %49 {strides = array<i32>} : memref<2x1x4xf32, #tpu.memory_space<vmem>>, vector<2x1x4xf32>,
    } else {
    }
    return
  }
  func.func @transform_0(%arg0: i32, %arg1: i32) -> (i32, i32, i32) {
    %c0_i32 = arith.constant 0 : i32
    %c0_i32_0 = arith.constant 0 : i32
    return %arg0, %c0_i32, %arg1 : i32, i32, i32
  }
  func.func @transform_1(%arg0: i32, %arg1: i32) -> (i32, i32) {
    %c0_i32 = arith.constant 0 : i32
    %c0_i32_0 = arith.constant 0 : i32
    %c0_i32_1 = arith.constant 0 : i32
    return %c0_i32, %c0_i32_0 : i32, i32
  }
  func.func @transform_2(%arg0: i32, %arg1: i32) -> (i32, i32) {
    %c0_i32 = arith.constant 0 : i32
    %c0_i32_0 = arith.constant 0 : i32
    %c0_i32_1 = arith.constant 0 : i32
    return %c0_i32, %c0_i32_0 : i32, i32
  }
  func.func @transform_3(%arg0: i32, %arg1: i32) -> (i32, i32) {
    %c0_i32 = arith.constant 0 : i32
    %c0_i32_0 = arith.constant 0 : i32
    %c0_i32_1 = arith.constant 0 : i32
    return %c0_i32, %c0_i32_0 : i32, i32
  }
  func.func @transform_4(%arg0: i32, %arg1: i32) -> (i32, i32) {
    %c0_i32 = arith.constant 0 : i32
    %c0_i32_0 = arith.constant 0 : i32
    %c0_i32_1 = arith.constant 0 : i32
    return %c0_i32, %c0_i32_0 : i32, i32
  }
  func.func @transform_5(%arg0: i32, %arg1: i32) -> (i32, i32, i32) {
    %c0_i32 = arith.constant 0 : i32
    %c0_i32_0 = arith.constant 0 : i32
    %c0_i32_1 = arith.constant 0 : i32
    return %arg0, %c0_i32, %c0_i32_0 : i32, i32, i32
  }
}

</mosaic_0001>

<bundles_post_ra>
// kernel: tpu_custom_call.1
= control target key start
LH: loop header
LB: loop body
LE: loop exit
PB: predicated region body
PF: predicated region fallthrough
CT: control target
= control target key end

     0   :  { %10 = vsyncpa [#allocation5], 0  ;;  %s685_s0 = inlined_call_operand.hbm [shape: f32[2,4,256], index: 0, kind: input, shape index: {}]   ;;  %s686_s1 = inlined_call_operand.hbm [shape: f32[4,2], index: 1, kind: input, shape index: {}]   ;;  %s687_s2 = inlined_call_operand.hbm [shape: f32[1,2], index: 2, kind: input, shape index: {}]   ;;  %s688_s3 = inlined_call_operand.hbm [shape: f32[2,4], index: 3, kind: input, shape index: {}]   ;;  %s689_s4 = inlined_call_operand.hbm [shape: f32[1,4], index: 4, kind: input, shape index: {}]   ;;  %s690_s5 = inlined_call_operand.hbm [shape: f32[2,1,4], index: 5, kind: output, shape index: {}]  }
   0x1   :  { %11 = vsyncpa [#allocation8], 0 }
   0x2   :  { %12 = vsyncpa [#allocation11], 0 }
   0x3   :  { %13 = vsyncpa [#allocation6], 0  ;;  %s569_s18 = smov [#allocation7]   ;;  %s570_s20 = smov [#allocation10]  }
   0x4   :  { %s32_s19 = sshll.u32 %s569_s18, 4  ;;  %s52_s21 = sshll.u32 %s570_s20, 4  ;;  %s33_s19 = int_to_ptr.vmem [resolvable:$true] %s32_s19  ;;  %s53_s21 = int_to_ptr.vmem [resolvable:$true] %s52_s21 }
   0x5   :  { %s429_s24 = scalar_lea.hbm %s686_s1, 64 }
   0x6   :  { %p430_p0 = scmp.ne.s32.totalorder %s686_s1, %s429_s24  ;;  %p433_p1 = scmp.lt.u32.totalorder %s429_s24, %s686_s1 }
   0x8   :  { %p435_p2 = pnand %p433_p1, %p430_p0 }
   0xa   :  { %438 = shalt.err (!%p435_p2)
}
   0xb   :  { %s439_s29 = scalar_lea.vmem %s33_s19, 64  ;;  %p444_p4 = scmp.lt.s32.totalorder %s33_s19, %s33_s19 }
   0xc   :  { %p440_p3 = scmp.ne.s32.totalorder %s33_s19, %s439_s29  ;;  %p445_p5 = scmp.lt.s32.totalorder %s439_s29, %s439_s29 }
   0xe   :  { %p446_p6 = por %p445_p5, %p444_p4 }
  0x10   :  { %p447_p7 = pnand %p446_p6, %p440_p3 }
  0x12   :  { %450 = shalt.err (!%p447_p7)
}
  0x13   :  { %35 = dma.hbm_to_vmem [thread:$0]  %s686_s1, 64, %s33_s19, [#allocation8]  }
  0x14   :  { %s451_s9 = scalar_lea.hbm %s688_s3, 32 }
  0x15   :  { %p452_p8 = scmp.ne.s32.totalorder %s688_s3, %s451_s9  ;;  %p455_p9 = scmp.lt.u32.totalorder %s451_s9, %s688_s3 }
  0x17   :  { %p457_p10 = pnand %p455_p9, %p452_p8 }
  0x19   :  { %460 = shalt.err (!%p457_p10)
}
  0x1a   :  { %s461_s14 = scalar_lea.vmem %s53_s21, 32  ;;  %p466_p12 = scmp.lt.s32.totalorder %s53_s21, %s53_s21 }
  0x1b   :  { %p462_p11 = scmp.ne.s32.totalorder %s53_s21, %s461_s14  ;;  %p467_p13 = scmp.lt.s32.totalorder %s461_s14, %s461_s14 }
  0x1d   :  { %p468_p0 = por %p467_p13, %p466_p12 }
  0x1f   :  { %p469_p1 = pnand %p468_p0, %p462_p11 }
  0x21   :  { %472 = shalt.err (!%p469_p1)
}
  0x22   :  { %55 = dma.hbm_to_vmem [thread:$0]  %s688_s3, 32, %s53_s21, [#allocation11]  }
  0x23   :  { %s571_s16 = smov [#allocation4]   ;;  %s473_s20 = scalar_lea.hbm %s685_s0, 256 }
  0x24   :  { %s19_s17 = sshll.u32 %s571_s16, 4  ;;  %p474_p2 = scmp.ne.s32.totalorder %s685_s0, %s473_s20  ;;  %s20_s17 = int_to_ptr.vmem [resolvable:$true] %s19_s17 }
  0x25   :  { %p477_p3 = scmp.lt.u32.totalorder %s473_s20, %s685_s0 }
  0x27   :  { %p479_p4 = pnand %p477_p3, %p474_p2 }
  0x29   :  { %482 = shalt.err (!%p479_p4)
}
  0x2a   :  { %s483_s26 = scalar_lea.vmem %s20_s17, 256  ;;  %p488_p6 = scmp.lt.s32.totalorder %s20_s17, %s20_s17 }
  0x2b   :  { %p484_p5 = scmp.ne.s32.totalorder %s20_s17, %s483_s26  ;;  %p489_p7 = scmp.lt.s32.totalorder %s483_s26, %s483_s26 }
  0x2d   :  { %p490_p8 = por %p489_p7, %p488_p6 }
  0x2f   :  { %p491_p9 = pnand %p490_p8, %p484_p5 }
  0x31   :  { %494 = shalt.err (!%p491_p9)
}
  0x32   :  { %s572_s3 = smov 128   ;;  %s573_s21 = smov 8  }
  0x33   :  { %25 = dma.hbm_to_vmem [thread:$0]  %s685_s0, 256, %s20_s17, [#allocation5], %s572_s3, %s572_s3, %s573_s21  }
  0x34   :  { %s574_s29 = smov [#allocation9]   ;;  %s575_s6 = smov [#allocation12]  }
  0x35   :  { %s42_s30 = sshll.u32 %s574_s29, 4  ;;  %s62_s7 = sshll.u32 %s575_s6, 4  ;;  %s43_s30 = int_to_ptr.vmem [resolvable:$true] %s42_s30  ;;  %s63_s7 = int_to_ptr.vmem [resolvable:$true] %s62_s7 }
  0x36   :  { %s495_s10 = scalar_lea.hbm %s687_s2, 16 }
  0x37   :  { %p496_p10 = scmp.ne.s32.totalorder %s687_s2, %s495_s10  ;;  %p499_p11 = scmp.lt.u32.totalorder %s495_s10, %s687_s2 }
  0x39   :  { %p501_p12 = pnand %p499_p11, %p496_p10 }
  0x3b   :  { %504 = shalt.err (!%p501_p12)
}
  0x3c   :  { %s505_s0 = scalar_lea.vmem %s43_s30, 16  ;;  %s509_s1 = scalar_lea.vmem %s43_s30, 32 }
  0x3d   :  { %p506_p13 = scmp.ne.s32.totalorder %s43_s30, %s505_s0  ;;  %p510_p0 = scmp.lt.s32.totalorder %s43_s30, %s43_s30 }
  0x3e   :  { %p511_p1 = scmp.lt.s32.totalorder %s509_s1, %s505_s0 }
  0x40   :  { %p512_p2 = por %p511_p1, %p510_p0 }
  0x42   :  { %p513_p3 = pnand %p512_p2, %p506_p13 }
  0x44   :  { %516 = shalt.err (!%p513_p3)
}
  0x45   :  { %45 = dma.hbm_to_vmem [thread:$0]  %s687_s2, 16, %s43_s30, [#allocation8]  }
  0x46   :  { %s517_s19 = scalar_lea.hbm %s689_s4, 16 }
  0x47   :  { %p518_p4 = scmp.ne.s32.totalorder %s689_s4, %s517_s19  ;;  %p521_p5 = scmp.lt.u32.totalorder %s517_s19, %s689_s4 }
  0x49   :  { %p523_p6 = pnand %p521_p5, %p518_p4 }
  0x4b   :  { %526 = shalt.err (!%p523_p6)
}
  0x4c   :  { %s527_s25 = scalar_lea.vmem %s63_s7, 16  ;;  %s531_s26 = scalar_lea.vmem %s63_s7, 32 }
  0x4d   :  { %p528_p7 = scmp.ne.s32.totalorder %s63_s7, %s527_s25  ;;  %p532_p8 = scmp.lt.s32.totalorder %s63_s7, %s63_s7 }
  0x4e   :  { %p533_p9 = scmp.lt.s32.totalorder %s531_s26, %s527_s25 }
  0x50   :  { %p534_p10 = por %p533_p9, %p532_p8 }
  0x52   :  { %p535_p11 = pnand %p534_p10, %p528_p7 }
  0x54   :  { %538 = shalt.err (!%p535_p11)
}
  0x55   :  { %65 = dma.hbm_to_vmem [thread:$0]  %s689_s4, 16, %s63_s7, [#allocation11]  }
  0x56   :  { %561 = dma.done.wait [#allocation5], 256  }
  0x57   :  { %562 = vsyncadd [#allocation5], 4294967040 }
  0x58   :  { %563 = dma.done.wait [#allocation8], 80  }
  0x59   :  { %564 = vsyncadd [#allocation8], 4294967216 }
  0x5a   :  { %565 = dma.done.wait [#allocation11], 48  }
  0x5b   :  { %566 = vsyncadd [#allocation11], 4294967248  ;;  %v576_v0 = vmov -inf   ;;  %v577_v1 = vmov 0.0   ;;  %v93_v2 = vld [vmem:[#allocation4] sm:$0xf]  ;;  %v134_v27 = vlaneseq }
  0x5c   :  { %87 = vst [vmem:[#allocation3] sm:$0xf] %v576_v0  ;;  %88 = vst [vmem:[#allocation3 + $0x4] sm:$0xf] %v576_v0  ;;  %401 = vmatprep.subr.mxu0 %v577_v1  ;;  %406 = vmatprep.subr.mxu1 %v577_v1  ;;  %v100_v3 = vld [vmem:[#allocation4 + $0x4] sm:$0xf] }
  0x5d   :  { %85 = vst [vmem:[#allocation2] sm:$0xf] %v577_v1  ;;  %86 = vst [vmem:[#allocation2 + $0x4] sm:$0xf] %v577_v1  ;;  %v94_v4 = vld [vmem:[#allocation4 + $0x8] sm:$0xf] }
  0x5e   :  { %v101_v11 = vld [vmem:[#allocation4 + $0xc] sm:$0xf]  ;;  %vm115_vm0 = vcmask 1043456   ;;  %v162_v26 = vld [vmem:[#allocation7] sm:$0xf]  ;;  %vm578_vm1 = vmmov 0  }
  0x5f   :  { %402 = vmatpush3.msk.msra.mxu0 %vm115_vm0, %v162_v26  ;;  %403 = vmatprep.mubr.msk.f32.mxu0 %vm578_vm1, %v577_v1  ;;  %v135_v28 = vand.u32 127, %v134_v27  ;;  %v137_v29 = vshrl.u32 %v134_v27, 7  ;;  %vm157_vm2 = vcmask 1043459   ;;  %vm144_vm3 = vcmask 1041409   ;;  %v248_v44 = vld [vmem:[#allocation10] sm:$0x3] }
  0x60   :  { %408 = vmatprep.mubr.msk.f32.mxu1 %vm578_vm1, %v577_v1  ;;  %vm160_vm4 = vcmask 1041408   ;;  %vm170_vm5 = vcmask 31744   ;;  %v390_v45 = vld [vmem:[#allocation9] ss:$0 sm:$0xff]  ;;  %vm256_vm6 = vcmask 15360   ;;  %s580_s4 = smov [#allocation13]  }
  0x61   :  { %v138_v32 = vsub.s32 %v135_v28, %v137_v29  ;;  %407 = vmatpush3.msk.msra.mxu1 %vm160_vm4, %v248_v44  ;;  %v393_v50 = vld [vmem:[#allocation12] ss:$0 sm:$0xff]  ;;  %v579_v59 = vmov 1966171168   ;;  %s376_s21 = sshll.u32 %s580_s4, 4  ;;  %vm368_vm7 = vcmask 24576   ;;  %s377_s21 = int_to_ptr.vmem [resolvable:$true] %s376_s21 }
  0x62   :  { %v345_v60 = vunpack.c.l.s4 %v579_v59  ;;  %s539_s27 = scalar_lea.vmem %s377_s21, 32  ;;  %p544_p13 = scmp.lt.s32.totalorder %s377_s21, %s377_s21 }
  0x63   :  { %v91_v5 = vld [vmem:[#allocation3] sm:$0xf]  ;;  %v92_v7 = vld [vmem:[#allocation3 + $0x4] sm:$0xf]  ;;  %p540_p12 = scmp.ne.s32.totalorder %s377_s21, %s539_s27  ;;  %p545_p0 = scmp.lt.s32.totalorder %s539_s27, %s539_s27 }
  0x64   :  { %v89_v6 = vld [vmem:[#allocation2] sm:$0xf]  ;;  %v97_v8 = vmax.f32 %v91_v5, %v93_v2  ;;  %v98_v10 = vmax.f32 %v92_v7, %v94_v4  ;;  %v90_v12 = vld [vmem:[#allocation2 + $0x4] sm:$0xf]  ;;  %v346_v61 = vunpack.c.0.s8 %v345_v60 }
  0x65   :  { %v95_v9 = vadd.f32 %v93_v2, %v89_v6  ;;  %v96_v13 = vadd.f32 %v94_v4, %v90_v12  ;;  %p546_p1 = por %p545_p0, %p544_p13 }
  0x66   :  { %v104_v14 = vmax.f32 %v97_v8, %v100_v3  ;;  %v105_v16 = vmax.f32 %v98_v10, %v101_v11  ;;  %v349_v62 = vsub.s32 %v346_v61, %v137_v29 }
  0x67   :  { %v102_v15 = vadd.f32 %v100_v3, %v95_v9  ;;  %v103_v17 = vadd.f32 %v101_v11, %v96_v13  ;;  %p547_p2 = pnand %p546_p1, %p540_p12 }
  0x68   :  { %108 = vst [vmem:[#allocation3] sm:$0xf] %v104_v14  ;;  %109 = vst [vmem:[#allocation3 + $0x4] sm:$0xf] %v105_v16 }
  0x69   :  { %106 = vst [vmem:[#allocation2] sm:$0xf] %v102_v15  ;;  %107 = vst [vmem:[#allocation2 + $0x4] sm:$0xf] %v103_v17 }
  0x6f   :  { %v124_v18 = vld [vmem:[#allocation3] sm:$0xf]  ;;  %v125_v20 = vld [vmem:[#allocation3 + $0x4] sm:$0xf] }
  0x70   :  { %v113_v19 = vld [vmem:[#allocation2] sm:$0xf]  ;;  %v126_v21 = vsel %vm115_vm0, %v124_v18, -inf  ;;  %v114_v23 = vld [vmem:[#allocation2 + $0x4] sm:$0xf]  ;;  %v129_v24 = vsel %vm115_vm0, %v125_v20, -inf }
  0x71   :  { %v116_v22 = vsel %vm115_vm0, %v113_v19, 0.0  ;;  %127 = vmax.xlane.f32.xlu1 %v126_v21  ;;  %v119_v25 = vsel %vm115_vm0, %v114_v23, 0.0 }
  0x72   :  { %117 = vadd.xlane.f32.xlu0 %v116_v22 }
  0x75   :  { %130 = vmax.xlane.f32.xlu1 %v129_v24 }
  0x76   :  { %120 = vadd.xlane.f32.xlu0 %v119_v25 }
  0xfe   :  { %v128_v30 = vpop.xlane.xlu1 %127 }
  0xff   :  { %v118_v31 = vpop.xlane.xlu0 %117  ;;  %v152_v38 = vrot.slane %v128_v30, %v138_v32 }
 0x100   :  { %v122_v33 = vmul.f32 0.00390625, %v118_v31 }
 0x102   :  { %v131_v34 = vpop.xlane.xlu1 %130  ;;  %v139_v39 = vrot.slane %v122_v33, %v138_v32 }
 0x103   :  { %v121_v35 = vpop.xlane.xlu0 %120  ;;  %v156_v36 = vrot.slane %v131_v34, %v138_v32 }
 0x104   :  { %v123_v37 = vmul.f32 0.00390625, %v121_v35 }
 0x105   :  { %v158_v41 = vsel %vm157_vm2, %v156_v36, %v152_v38 }
 0x106   :  { %v143_v40 = vrot.slane %v123_v37, %v138_v32 }
 0x108   :  { %v145_v42 = vsel %vm144_vm3, %v143_v40, %v139_v39 }
 0x109   :  { %v161_v43 = vsel %vm160_vm4, %v145_v42, %v158_v41 }
 0x10a   :  { %404 = vmatmul.mubr.msk.f32.vlgmr.msra.gmra.mrb[0].mxu0 %vm170_vm5, %v161_v43 }
 0x1dd   :  { %v243_v46 = vpop.f32.mrb[0].mxu0 }
 0x1de   :  { %v244_v47 = vadd.f32 %v390_v45, %v243_v46  ;;  %v405_v48 = vpop.f32.mrb[1].mxu0 }
 0x1e0   :  { %v247_v49 = vmax.f32 %v244_v47, 0.0 }
 0x1e2   :  { %409 = vmatmul.mubr.msk.f32.vlgmr.msra.gmra.mrb[0].mxu1 %vm256_vm6, %v247_v49 }
 0x2b5   :  { %v329_v51 = vpop.f32.mrb[0].mxu1 }
 0x2b6   :  { %v330_v52 = vadd.f32 %v393_v50, %v329_v51  ;;  %v410_v53 = vpop.f32.mrb[1].mxu1 }
 0x2b8   :  { %v334_v54 = vrot.slane %v330_v52, 2 }
 0x2ba   :  { %v336_v55 = vadd.f32 %v334_v54, %v330_v52 }
 0x2bc   :  { %v396_v56 = vmul.f32 -1.442695, %v336_v55 }
 0x2be   :  { %425 = vpow2.f32 %v396_v56 }
 0x2c8   :  { %v426_v57 = vpop.eup %425 }
 0x2c9   :  { %v340_v58 = vadd.f32 1.0, %v426_v57 }
 0x2cb   :  { %427 = vrcp.f32 %v340_v58 }
 0x2d5   :  { %v428_v63 = vpop.eup %427 }
 0x2d6   :  { %v350_v0 = vrot.slane %v428_v63, %v349_v62 }
 0x2d8   :  { %v351_v1 = vcombine.high %v350_v0, %v350_v0  ;;  %v358_v2 = vrot.slane %v350_v0, %v349_v62 }
 0x2da   :  { %v365_v3 = vrot.slane %v351_v1, %v349_v62  ;;  %369 = vst.msk [vmem:[#allocation13] sm:$0x1] %vm368_vm7, %v358_v2 }
 0x2dc   :  { %370 = vst.msk [vmem:[#allocation13 + $0x1] sm:$0x1] %vm368_vm7, %v365_v3 }
 0x2dd   :  { %550 = shalt.err (!%p547_p2)
}
 0x2de   :  { %s551_s30 = scalar_lea.hbm %s690_s5, 32 }
 0x2df   :  { %p552_p3 = scmp.ne.s32.totalorder %s690_s5, %s551_s30  ;;  %p555_p4 = scmp.lt.u32.totalorder %s551_s30, %s690_s5 }
 0x2e1   :  { %p557_p5 = pnand %p555_p4, %p552_p3 }
 0x2e3   :  { %560 = shalt.err (!%p557_p5)
}
 0x2e4   :  { %s581_s10 = smov 16   ;;  %s582_s11 = smov 1  }
 0x2e5   :  { %382 = dma.vmem_to_hbm [thread:$0]  %s377_s21, 32, %s690_s5, [#allocation6], %s581_s10, %s581_s10, %s582_s11  }
 0x2e6   :  { %567 = dma.done.wait [#allocation6], 32  }
 0x2e7   :  { %568 = vsyncadd [#allocation6], 4294967264 }
 0x2e8   :  { %386 = vsyncpa [#allocation5], 1 }
 0x2e9   :  { %387 = vsyncpa [#allocation8], 1 }
 0x2ea   :  { %388 = vsyncpa [#allocation11], 1 }
 0x2eb   :  { %389 = vsyncpa [#allocation6], 1 }

// kernel: tpu_custom_call.1
= control target key start
LH: loop header
LB: loop body
LE: loop exit
PB: predicated region body
PF: predicated region fallthrough
CT: control target
= control target key end

     0   :  { %10 = vsyncpa [#allocation5], 0  ;;  %s685_s0 = inlined_call_operand.hbm [shape: f32[2,4,256], index: 0, kind: input, shape index: {}]   ;;  %s686_s1 = inlined_call_operand.hbm [shape: f32[4,2], index: 1, kind: input, shape index: {}]   ;;  %s687_s2 = inlined_call_operand.hbm [shape: f32[1,2], index: 2, kind: input, shape index: {}]   ;;  %s688_s3 = inlined_call_operand.hbm [shape: f32[2,4], index: 3, kind: input, shape index: {}]   ;;  %s689_s4 = inlined_call_operand.hbm [shape: f32[1,4], index: 4, kind: input, shape index: {}]   ;;  %s690_s5 = inlined_call_operand.hbm [shape: f32[2,1,4], index: 5, kind: output, shape index: {}]  }
   0x1   :  { %11 = vsyncpa [#allocation8], 0 }
   0x2   :  { %12 = vsyncpa [#allocation11], 0 }
   0x3   :  { %13 = vsyncpa [#allocation6], 0  ;;  %s569_s18 = smov [#allocation7]   ;;  %s570_s20 = smov [#allocation10]  }
   0x4   :  { %s32_s19 = sshll.u32 %s569_s18, 4  ;;  %s52_s21 = sshll.u32 %s570_s20, 4  ;;  %s33_s19 = int_to_ptr.vmem [resolvable:$true] %s32_s19  ;;  %s53_s21 = int_to_ptr.vmem [resolvable:$true] %s52_s21 }
   0x5   :  { %s429_s24 = scalar_lea.hbm %s686_s1, 64 }
   0x6   :  { %p430_p0 = scmp.ne.s32.totalorder %s686_s1, %s429_s24  ;;  %p433_p1 = scmp.lt.u32.totalorder %s429_s24, %s686_s1 }
   0x8   :  { %p435_p2 = pnand %p433_p1, %p430_p0 }
   0xa   :  { %438 = shalt.err (!%p435_p2)
}
   0xb   :  { %s439_s29 = scalar_lea.vmem %s33_s19, 64  ;;  %p444_p4 = scmp.lt.s32.totalorder %s33_s19, %s33_s19 }
   0xc   :  { %p440_p3 = scmp.ne.s32.totalorder %s33_s19, %s439_s29  ;;  %p445_p5 = scmp.lt.s32.totalorder %s439_s29, %s439_s29 }
   0xe   :  { %p446_p6 = por %p445_p5, %p444_p4 }
  0x10   :  { %p447_p7 = pnand %p446_p6, %p440_p3 }
  0x12   :  { %450 = shalt.err (!%p447_p7)
}
  0x13   :  { %35 = dma.hbm_to_vmem [thread:$0]  %s686_s1, 64, %s33_s19, [#allocation8]  }
  0x14   :  { %s451_s9 = scalar_lea.hbm %s688_s3, 32 }
  0x15   :  { %p452_p8 = scmp.ne.s32.totalorder %s688_s3, %s451_s9  ;;  %p455_p9 = scmp.lt.u32.totalorder %s451_s9, %s688_s3 }
  0x17   :  { %p457_p10 = pnand %p455_p9, %p452_p8 }
  0x19   :  { %460 = shalt.err (!%p457_p10)
}
  0x1a   :  { %s461_s14 = scalar_lea.vmem %s53_s21, 32  ;;  %p466_p12 = scmp.lt.s32.totalorder %s53_s21, %s53_s21 }
  0x1b   :  { %p462_p11 = scmp.ne.s32.totalorder %s53_s21, %s461_s14  ;;  %p467_p13 = scmp.lt.s32.totalorder %s461_s14, %s461_s14 }
  0x1d   :  { %p468_p0 = por %p467_p13, %p466_p12 }
  0x1f   :  { %p469_p1 = pnand %p468_p0, %p462_p11 }
  0x21   :  { %472 = shalt.err (!%p469_p1)
}
  0x22   :  { %55 = dma.hbm_to_vmem [thread:$0]  %s688_s3, 32, %s53_s21, [#allocation11]  }
  0x23   :  { %s571_s16 = smov [#allocation4]   ;;  %s473_s20 = scalar_lea.hbm %s685_s0, 256 }
  0x24   :  { %s19_s17 = sshll.u32 %s571_s16, 4  ;;  %p474_p2 = scmp.ne.s32.totalorder %s685_s0, %s473_s20  ;;  %s20_s17 = int_to_ptr.vmem [resolvable:$true] %s19_s17 }
  0x25   :  { %p477_p3 = scmp.lt.u32.totalorder %s473_s20, %s685_s0 }
  0x27   :  { %p479_p4 = pnand %p477_p3, %p474_p2 }
  0x29   :  { %482 = shalt.err (!%p479_p4)
}
  0x2a   :  { %s483_s26 = scalar_lea.vmem %s20_s17, 256  ;;  %p488_p6 = scmp.lt.s32.totalorder %s20_s17, %s20_s17 }
  0x2b   :  { %p484_p5 = scmp.ne.s32.totalorder %s20_s17, %s483_s26  ;;  %p489_p7 = scmp.lt.s32.totalorder %s483_s26, %s483_s26 }
  0x2d   :  { %p490_p8 = por %p489_p7, %p488_p6 }
  0x2f   :  { %p491_p9 = pnand %p490_p8, %p484_p5 }
  0x31   :  { %494 = shalt.err (!%p491_p9)
}
  0x32   :  { %s572_s3 = smov 128   ;;  %s573_s21 = smov 8  }
  0x33   :  { %25 = dma.hbm_to_vmem [thread:$0]  %s685_s0, 256, %s20_s17, [#allocation5], %s572_s3, %s572_s3, %s573_s21  }
  0x34   :  { %s574_s29 = smov [#allocation9]   ;;  %s575_s6 = smov [#allocation12]  }
  0x35   :  { %s42_s30 = sshll.u32 %s574_s29, 4  ;;  %s62_s7 = sshll.u32 %s575_s6, 4  ;;  %s43_s30 = int_to_ptr.vmem [resolvable:$true] %s42_s30  ;;  %s63_s7 = int_to_ptr.vmem [resolvable:$true] %s62_s7 }
  0x36   :  { %s495_s10 = scalar_lea.hbm %s687_s2, 16 }
  0x37   :  { %p496_p10 = scmp.ne.s32.totalorder %s687_s2, %s495_s10  ;;  %p499_p11 = scmp.lt.u32.totalorder %s495_s10, %s687_s2 }
  0x39   :  { %p501_p12 = pnand %p499_p11, %p496_p10 }
  0x3b   :  { %504 = shalt.err (!%p501_p12)
}
  0x3c   :  { %s505_s0 = scalar_lea.vmem %s43_s30, 16  ;;  %s509_s1 = scalar_lea.vmem %s43_s30, 32 }
  0x3d   :  { %p506_p13 = scmp.ne.s32.totalorder %s43_s30, %s505_s0  ;;  %p510_p0 = scmp.lt.s32.totalorder %s43_s30, %s43_s30 }
  0x3e   :  { %p511_p1 = scmp.lt.s32.totalorder %s509_s1, %s505_s0 }
  0x40   :  { %p512_p2 = por %p511_p1, %p510_p0 }
  0x42   :  { %p513_p3 = pnand %p512_p2, %p506_p13 }
  0x44   :  { %516 = shalt.err (!%p513_p3)
}
  0x45   :  { %45 = dma.hbm_to_vmem [thread:$0]  %s687_s2, 16, %s43_s30, [#allocation8]  }
  0x46   :  { %s517_s19 = scalar_lea.hbm %s689_s4, 16 }
  0x47   :  { %p518_p4 = scmp.ne.s32.totalorder %s689_s4, %s517_s19  ;;  %p521_p5 = scmp.lt.u32.totalorder %s517_s19, %s689_s4 }
  0x49   :  { %p523_p6 = pnand %p521_p5, %p518_p4 }
  0x4b   :  { %526 = shalt.err (!%p523_p6)
}
  0x4c   :  { %s527_s25 = scalar_lea.vmem %s63_s7, 16  ;;  %s531_s26 = scalar_lea.vmem %s63_s7, 32 }
  0x4d   :  { %p528_p7 = scmp.ne.s32.totalorder %s63_s7, %s527_s25  ;;  %p532_p8 = scmp.lt.s32.totalorder %s63_s7, %s63_s7 }
  0x4e   :  { %p533_p9 = scmp.lt.s32.totalorder %s531_s26, %s527_s25 }
  0x50   :  { %p534_p10 = por %p533_p9, %p532_p8 }
  0x52   :  { %p535_p11 = pnand %p534_p10, %p528_p7 }
  0x54   :  { %538 = shalt.err (!%p535_p11)
}
  0x55   :  { %65 = dma.hbm_to_vmem [thread:$0]  %s689_s4, 16, %s63_s7, [#allocation11]  }
  0x56   :  { %561 = dma.done.wait [#allocation5], 256  }
  0x57   :  { %562 = vsyncadd [#allocation5], 4294967040 }
  0x58   :  { %563 = dma.done.wait [#allocation8], 80  }
  0x59   :  { %564 = vsyncadd [#allocation8], 4294967216 }
  0x5a   :  { %565 = dma.done.wait [#allocation11], 48  }
  0x5b   :  { %566 = vsyncadd [#allocation11], 4294967248  ;;  %v576_v0 = vmov -inf   ;;  %v577_v1 = vmov 0.0   ;;  %v93_v2 = vld [vmem:[#allocation4] sm:$0xf]  ;;  %v134_v27 = vlaneseq }
  0x5c   :  { %87 = vst [vmem:[#allocation3] sm:$0xf] %v576_v0  ;;  %88 = vst [vmem:[#allocation3 + $0x4] sm:$0xf] %v576_v0  ;;  %401 = vmatprep.subr.mxu0 %v577_v1  ;;  %406 = vmatprep.subr.mxu1 %v577_v1  ;;  %v100_v3 = vld [vmem:[#allocation4 + $0x4] sm:$0xf] }
  0x5d   :  { %85 = vst [vmem:[#allocation2] sm:$0xf] %v577_v1  ;;  %86 = vst [vmem:[#allocation2 + $0x4] sm:$0xf] %v577_v1  ;;  %v94_v4 = vld [vmem:[#allocation4 + $0x8] sm:$0xf] }
  0x5e   :  { %v101_v11 = vld [vmem:[#allocation4 + $0xc] sm:$0xf]  ;;  %vm115_vm0 = vcmask 1043456   ;;  %v162_v26 = vld [vmem:[#allocation7] sm:$0xf]  ;;  %vm578_vm1 = vmmov 0  }
  0x5f   :  { %402 = vmatpush3.msk.msra.mxu0 %vm115_vm0, %v162_v26  ;;  %403 = vmatprep.mubr.msk.f32.mxu0 %vm578_vm1, %v577_v1  ;;  %v135_v28 = vand.u32 127, %v134_v27  ;;  %v137_v29 = vshrl.u32 %v134_v27, 7  ;;  %vm157_vm2 = vcmask 1043459   ;;  %vm144_vm3 = vcmask 1041409   ;;  %v248_v44 = vld [vmem:[#allocation10] sm:$0x3] }
  0x60   :  { %408 = vmatprep.mubr.msk.f32.mxu1 %vm578_vm1, %v577_v1  ;;  %vm160_vm4 = vcmask 1041408   ;;  %vm170_vm5 = vcmask 31744   ;;  %v390_v45 = vld [vmem:[#allocation9] ss:$0 sm:$0xff]  ;;  %vm256_vm6 = vcmask 15360   ;;  %s580_s4 = smov [#allocation13]  }
  0x61   :  { %v138_v32 = vsub.s32 %v135_v28, %v137_v29  ;;  %407 = vmatpush3.msk.msra.mxu1 %vm160_vm4, %v248_v44  ;;  %v393_v50 = vld [vmem:[#allocation12] ss:$0 sm:$0xff]  ;;  %v579_v59 = vmov 1966171168   ;;  %s376_s21 = sshll.u32 %s580_s4, 4  ;;  %vm368_vm7 = vcmask 24576   ;;  %s377_s21 = int_to_ptr.vmem [resolvable:$true] %s376_s21 }
  0x62   :  { %v345_v60 = vunpack.c.l.s4 %v579_v59  ;;  %s539_s27 = scalar_lea.vmem %s377_s21, 32  ;;  %p544_p13 = scmp.lt.s32.totalorder %s377_s21, %s377_s21 }
  0x63   :  { %v91_v5 = vld [vmem:[#allocation3] sm:$0xf]  ;;  %v92_v7 = vld [vmem:[#allocation3 + $0x4] sm:$0xf]  ;;  %p540_p12 = scmp.ne.s32.totalorder %s377_s21, %s539_s27  ;;  %p545_p0 = scmp.lt.s32.totalorder %s539_s27, %s539_s27 }
  0x64   :  { %v89_v6 = vld [vmem:[#allocation2] sm:$0xf]  ;;  %v97_v8 = vmax.f32 %v91_v5, %v93_v2  ;;  %v98_v10 = vmax.f32 %v92_v7, %v94_v4  ;;  %v90_v12 = vld [vmem:[#allocation2 + $0x4] sm:$0xf]  ;;  %v346_v61 = vunpack.c.0.s8 %v345_v60 }
  0x65   :  { %v95_v9 = vadd.f32 %v93_v2, %v89_v6  ;;  %v96_v13 = vadd.f32 %v94_v4, %v90_v12  ;;  %p546_p1 = por %p545_p0, %p544_p13 }
  0x66   :  { %v104_v14 = vmax.f32 %v97_v8, %v100_v3  ;;  %v105_v16 = vmax.f32 %v98_v10, %v101_v11  ;;  %v349_v62 = vsub.s32 %v346_v61, %v137_v29 }
  0x67   :  { %v102_v15 = vadd.f32 %v100_v3, %v95_v9  ;;  %v103_v17 = vadd.f32 %v101_v11, %v96_v13  ;;  %p547_p2 = pnand %p546_p1, %p540_p12 }
  0x68   :  { %108 = vst [vmem:[#allocation3] sm:$0xf] %v104_v14  ;;  %109 = vst [vmem:[#allocation3 + $0x4] sm:$0xf] %v105_v16 }
  0x69   :  { %106 = vst [vmem:[#allocation2] sm:$0xf] %v102_v15  ;;  %107 = vst [vmem:[#allocation2 + $0x4] sm:$0xf] %v103_v17 }
  0x6f   :  { %v124_v18 = vld [vmem:[#allocation3] sm:$0xf]  ;;  %v125_v20 = vld [vmem:[#allocation3 + $0x4] sm:$0xf] }
  0x70   :  { %v113_v19 = vld [vmem:[#allocation2] sm:$0xf]  ;;  %v126_v21 = vsel %vm115_vm0, %v124_v18, -inf  ;;  %v114_v23 = vld [vmem:[#allocation2 + $0x4] sm:$0xf]  ;;  %v129_v24 = vsel %vm115_vm0, %v125_v20, -inf }
  0x71   :  { %v116_v22 = vsel %vm115_vm0, %v113_v19, 0.0  ;;  %127 = vmax.xlane.f32.xlu1 %v126_v21  ;;  %v119_v25 = vsel %vm115_vm0, %v114_v23, 0.0 }
  0x72   :  { %117 = vadd.xlane.f32.xlu0 %v116_v22 }
  0x75   :  { %130 = vmax.xlane.f32.xlu1 %v129_v24 }
  0x76   :  { %120 = vadd.xlane.f32.xlu0 %v119_v25 }
  0xfe   :  { %v128_v30 = vpop.xlane.xlu1 %127 }
  0xff   :  { %v118_v31 = vpop.xlane.xlu0 %117  ;;  %v152_v38 = vrot.slane %v128_v30, %v138_v32 }
 0x100   :  { %v122_v33 = vmul.f32 0.00390625, %v118_v31 }
 0x102   :  { %v131_v34 = vpop.xlane.xlu1 %130  ;;  %v139_v39 = vrot.slane %v122_v33, %v138_v32 }
 0x103   :  { %v121_v35 = vpop.xlane.xlu0 %120  ;;  %v156_v36 = vrot.slane %v131_v34, %v138_v32 }
 0x104   :  { %v123_v37 = vmul.f32 0.00390625, %v121_v35 }
 0x105   :  { %v158_v41 = vsel %vm157_vm2, %v156_v36, %v152_v38 }
 0x106   :  { %v143_v40 = vrot.slane %v123_v37, %v138_v32 }
 0x108   :  { %v145_v42 = vsel %vm144_vm3, %v143_v40, %v139_v39 }
 0x109   :  { %v161_v43 = vsel %vm160_vm4, %v145_v42, %v158_v41 }
 0x10a   :  { %404 = vmatmul.mubr.msk.f32.vlgmr.msra.gmra.mrb[0].mxu0 %vm170_vm5, %v161_v43 }
 0x1dd   :  { %v243_v46 = vpop.f32.mrb[0].mxu0 }
 0x1de   :  { %v244_v47 = vadd.f32 %v390_v45, %v243_v46  ;;  %v405_v48 = vpop.f32.mrb[1].mxu0 }
 0x1e0   :  { %v247_v49 = vmax.f32 %v244_v47, 0.0 }
 0x1e2   :  { %409 = vmatmul.mubr.msk.f32.vlgmr.msra.gmra.mrb[0].mxu1 %vm256_vm6, %v247_v49 }
 0x2b5   :  { %v329_v51 = vpop.f32.mrb[0].mxu1 }
 0x2b6   :  { %v330_v52 = vadd.f32 %v393_v50, %v329_v51  ;;  %v410_v53 = vpop.f32.mrb[1].mxu1 }
 0x2b8   :  { %v334_v54 = vrot.slane %v330_v52, 2 }
 0x2ba   :  { %v336_v55 = vadd.f32 %v334_v54, %v330_v52 }
 0x2bc   :  { %v396_v56 = vmul.f32 -1.442695, %v336_v55 }
 0x2be   :  { %425 = vpow2.f32 %v396_v56 }
 0x2c8   :  { %v426_v57 = vpop.eup %425 }
 0x2c9   :  { %v340_v58 = vadd.f32 1.0, %v426_v57 }
 0x2cb   :  { %427 = vrcp.f32 %v340_v58 }
 0x2d5   :  { %v428_v63 = vpop.eup %427 }
 0x2d6   :  { %v350_v0 = vrot.slane %v428_v63, %v349_v62 }
 0x2d8   :  { %v351_v1 = vcombine.high %v350_v0, %v350_v0  ;;  %v358_v2 = vrot.slane %v350_v0, %v349_v62 }
 0x2da   :  { %v365_v3 = vrot.slane %v351_v1, %v349_v62  ;;  %369 = vst.msk [vmem:[#allocation13] sm:$0x1] %vm368_vm7, %v358_v2 }
 0x2dc   :  { %370 = vst.msk [vmem:[#allocation13 + $0x1] sm:$0x1] %vm368_vm7, %v365_v3 }
 0x2dd   :  { %550 = shalt.err (!%p547_p2)
}
 0x2de   :  { %s551_s30 = scalar_lea.hbm %s690_s5, 32 }
 0x2df   :  { %p552_p3 = scmp.ne.s32.totalorder %s690_s5, %s551_s30  ;;  %p555_p4 = scmp.lt.u32.totalorder %s551_s30, %s690_s5 }
 0x2e1   :  { %p557_p5 = pnand %p555_p4, %p552_p3 }
 0x2e3   :  { %560 = shalt.err (!%p557_p5)
}
 0x2e4   :  { %s581_s10 = smov 16   ;;  %s582_s11 = smov 1  }
 0x2e5   :  { %382 = dma.vmem_to_hbm [thread:$0]  %s377_s21, 32, %s690_s5, [#allocation6], %s581_s10, %s581_s10, %s582_s11  }
 0x2e6   :  { %567 = dma.done.wait [#allocation6], 32  }
 0x2e7   :  { %568 = vsyncadd [#allocation6], 4294967264 }
 0x2e8   :  { %386 = vsyncpa [#allocation5], 1 }
 0x2e9   :  { %387 = vsyncpa [#allocation8], 1 }
 0x2ea   :  { %388 = vsyncpa [#allocation11], 1 }
 0x2eb   :  { %389 = vsyncpa [#allocation6], 1 }

</bundles_post_ra>
